<compile_context>
chip_gen: v7x
topology: tpu7x:2x2x1
jax: 0.10.0
libtpu: 0.0.40
codegen_flags: <defaults>
</compile_context>

<pallas_src>
import jax
import jax.numpy as jnp
from jax import lax
from jax.experimental import pallas as pl
from jax.experimental.pallas import tpu as pltpu


def mlp_kernel(x_ref, w1_ref, b1_ref, w2_ref, b2_ref, o_ref):
    # x_ref : (TB, DIM)  natural batch-major tile (no HBM transpose)
    # w1_ref: (HID, DIM) torch layout, resident across grid steps
    # b1_ref: (HID, 1)   f32 bias column (broadcast over lanes)
    # w2_ref: (HID, 1)   f32 second-layer weight column
    # b2_ref: (1,)       f32 scalar in SMEM
    # o_ref : (1, TB)    lane-dense output block
    #
    # h = W1 @ x^T, expressed as a QK^T-style contraction of both last dims -> (HID, TB).
    h = lax.dot_general(
        w1_ref[...], x_ref[...],
        dimension_numbers=(((1,), (1,)), ((), ())),
        preferred_element_type=jnp.float32)                       # MXU, f32 accumulate
    h = jnp.maximum(h + b1_ref[...], 0.0)                         # VPU bias + ReLU (f32)
    # Second linear (out_features == 1): VPU multiply + sublane reduce instead of an
    # N=1 MXU matmul that would use 1/128-1/256 of the systolic array.
    y = jnp.sum(h * w2_ref[...], axis=0, keepdims=True)           # (1, TB)
    o_ref[...] = (y + b2_ref[0]).astype(o_ref.dtype)


def _pick_tile_b(B):
    """Largest lane-dense batch tile: prefer >= 4 grid steps (>= 2 per v7x TensorCore),
    multiples of 512 so each MXU push on the 256-wide v6e/v7x array gets full N chunks."""
    for min_steps in (4, 2, 1):
        for cand in (32768, 16384, 8192, 4096, 2048, 1024, 512, 256, 128):
            if B % cand == 0 and B // cand >= min_steps:
                return cand
    return B  # B not 128-aligned: single full-extent block


def network_forward(x, w1, b1, w2, b2, *, tile_b=None):
    """Forward pass of the depth=1 `Network` MLP.

    x: (B, dim) f32 or bf16, w1: (hidden, dim), b1: (hidden,), w2: (1, hidden), b2: (1,)
    Returns (B, 1) f32, matching the PyTorch module output shape.
    """
    B, dim = x.shape
    hidden = w1.shape[0]

    if tile_b is None:
        tile_b = _pick_tile_b(B)
    assert B % tile_b == 0, "batch must be divisible by tile_b"
    assert tile_b == B or tile_b % 128 == 0, "tile_b must be a multiple of 128 lanes"

    # Tiny weights: match W1 to the x dtype (bf16 keeps the MXU on its native path);
    # everything applied post-accumulation stays f32.
    w1_c = w1.astype(x.dtype)
    b1_col = b1.reshape(hidden, 1).astype(jnp.float32)
    w2_col = w2.reshape(hidden, 1).astype(jnp.float32)
    b2_s = b2.reshape(1).astype(jnp.float32)

    grid = (B // tile_b,)
    flops = 2 * B * dim * hidden + 2 * B * hidden
    bytes_accessed = (B * dim * x.dtype.itemsize          # x stream (dominant)
                      + B * 4                              # output
                      + hidden * dim * w1_c.dtype.itemsize # W1
                      + 4 * (2 * hidden + 1))              # b1, w2, b2

    y = pl.pallas_call(
        mlp_kernel,
        out_shape=jax.ShapeDtypeStruct((1, B), jnp.float32),
        grid=grid,
        in_specs=[
            # x streamed in natural layout; add pipeline_mode=pl.Buffered(3) only if an
            # xprof trace shows exposed input DMA at the chosen tile_b.
            pl.BlockSpec((tile_b, dim), lambda i: (i, 0)),
            pl.BlockSpec((hidden, dim), lambda i: (0, 0)),        # W1 (resident)
            pl.BlockSpec((hidden, 1), lambda i: (0, 0)),          # b1 column (resident)
            pl.BlockSpec((hidden, 1), lambda i: (0, 0)),          # w2 column (resident)
            pl.BlockSpec(memory_space=pltpu.MemorySpace.SMEM),    # b2 scalar in SMEM
        ],
        out_specs=pl.BlockSpec((1, tile_b), lambda i: (0, i)),    # lane-dense output
        compiler_params=pltpu.CompilerParams(
            dimension_semantics=("parallel",),
        ),
        cost_estimate=pl.CostEstimate(
            flops=flops, transcendentals=0, bytes_accessed=bytes_accessed),
    )(x, w1_c, b1_col, w2_col, b2_s)

    # (1, B) -> (B, 1): same contiguous data order, metadata-only reshape.
    return y.reshape(B, 1)


if __name__ == "__main__":
    # Small but pipeline-exercising shapes: 1024 batch rows -> four 256-lane tiles
    # (>= 4 grid steps, >= 2 per v7x TensorCore), dim=16, hidden=32.
    B, DIM, HIDDEN = 1024, 16, 32

    key = jax.random.PRNGKey(0)
    kx, k1, k2, k3, k4 = jax.random.split(key, 5)
    x = jax.random.normal(kx, (B, DIM), dtype=jnp.float32)
    # Deterministic stand-in for torch.nn.init.normal_(mean=0, std=1) on each layer.
    w1 = jax.random.normal(k1, (HIDDEN, DIM), dtype=jnp.float32)   # torch layout (out, in)
    b1 = jax.random.normal(k2, (HIDDEN,), dtype=jnp.float32)
    w2 = jax.random.normal(k3, (1, HIDDEN), dtype=jnp.float32)
    b2 = jax.random.normal(k4, (1,), dtype=jnp.float32)

    # Producer-side bf16 cast: the dominant HBM stream (x) is stored/read as bf16;
    # accumulation and everything after the first matmul stay f32 inside the kernel.
    x_bf = x.astype(jnp.bfloat16)

    y = network_forward(x_bf, w1, b1, w2, b2)
    y = jax.block_until_ready(y)

    # Reference with the same bf16 input/weight rounding (f32 math thereafter), so the
    # check isolates kernel correctness from the deliberate bf16 streaming choice.
    xr = x_bf.astype(jnp.float32)
    w1r = w1.astype(jnp.bfloat16).astype(jnp.float32)
    ref = jnp.maximum(xr @ w1r.T + b1, 0.0) @ w2.T + b2

    assert y.shape == (B, 1)
    assert jnp.allclose(y, ref, atol=1e-3, rtol=1e-3), float(jnp.max(jnp.abs(y - ref)))

    print("KERNEL_OK")
</pallas_src>

<mosaic_0001>
module attributes {stable_mosaic.version = 11 : i64} {
  func.func @mlp_kernel(%arg0: i32, %arg1: memref<256x16xbf16, #tpu.memory_space<vmem>>, %arg2: memref<32x16xbf16, #tpu.memory_space<vmem>>, %arg3: memref<32x1xf32, #tpu.memory_space<vmem>>, %arg4: memref<32x1xf32, #tpu.memory_space<vmem>>, %arg5: memref<1xf32, #tpu.memory_space<smem>>, %arg6: memref<1x256xf32, #tpu.memory_space<vmem>>) attributes {dimension_semantics = [#tpu.dimension_semantics<parallel>], iteration_bounds = array<i64: 4>, scalar_prefetch = 0 : i64, scratch_operands = 0 : i64, tpu.core_type = #tpu.core_type<tc>, window_params = [{transform_indices = @transform_0, window_bounds = array<i64: 256, 16>}, {pipeline_mode = #tpu.pipeline_mode<synchronous>, transform_indices = @transform_1, window_bounds = array<i64: 32, 16>}, {pipeline_mode = #tpu.pipeline_mode<synchronous>, transform_indices = @transform_2, window_bounds = array<i64: 32, 1>}, {pipeline_mode = #tpu.pipeline_mode<synchronous>, transform_indices = @transform_3, window_bounds = array<i64: 32, 1>}, {transform_indices = @transform_4, window_bounds = array<i64: 1>}, {transform_indices = @transform_5, window_bounds = array<i64: 1, 256>}]} {
    %c0 = arith.constant 0 : index
    %c0_0 = arith.constant 0 : index
    %0 = vector.load %arg2[%c0, %c0_0] : memref<32x16xbf16, #tpu.memory_space<vmem>>, vector<32x16xbf16>
    %c0_1 = arith.constant 0 : index
    %c0_2 = arith.constant 0 : index
    %1 = vector.load %arg1[%c0_1, %c0_2] : memref<256x16xbf16, #tpu.memory_space<vmem>>, vector<256x16xbf16>
    %cst = arith.constant dense<0.000000e+00> : vector<32x256xf32>
    %2 = tpu.matmul %0, %1, %cst {dimension_numbers = #tpu.dot_dimension_numbers<[1], [1], [0], [0], [0, 0, 1, 0], [], []>} : vector<32x16xbf16>, vector<256x16xbf16>, vector<32x256xf32> -> vector<32x256xf32>
    %c0_3 = arith.constant 0 : index
    %c0_4 = arith.constant 0 : index
    %3 = vector.load %arg3[%c0_3, %c0_4] : memref<32x1xf32, #tpu.memory_space<vmem>>, vector<32x1xf32>
    %4 = vector.broadcast %3 : vector<32x1xf32> to vector<32x256xf32>
    %5 = arith.addf %2, %4 : vector<32x256xf32>
    %cst_5 = arith.constant 0.000000e+00 : f32
    %6 = vector.broadcast %cst_5 : f32 to vector<32x256xf32>
    %7 = arith.maximumf %5, %6 : vector<32x256xf32>
    %c0_6 = arith.constant 0 : index
    %c0_7 = arith.constant 0 : index
    %8 = vector.load %arg4[%c0_6, %c0_7] : memref<32x1xf32, #tpu.memory_space<vmem>>, vector<32x1xf32>
    %9 = vector.broadcast %8 : vector<32x1xf32> to vector<32x256xf32>
    %10 = arith.mulf %7, %9 : vector<32x256xf32>
    %cst_8 = arith.constant dense<0.000000e+00> : vector<256xf32>
    %11 = vector.multi_reduction <add>, %10, %cst_8 [0] : vector<32x256xf32> to vector<256xf32>
    %12 = vector.shape_cast %11 : vector<256xf32> to vector<1x256xf32>
    %c0_9 = arith.constant 0 : index
    %13 = memref.load %arg5[%c0_9] : memref<1xf32, #tpu.memory_space<smem>>
    %14 = vector.broadcast %13 : f32 to vector<1x256xf32>
    %15 = arith.addf %12, %14 : vector<1x256xf32>
    %c0_10 = arith.constant 0 : index
    %c0_11 = arith.constant 0 : index
    %16 = vector.load %arg6[%c0_10, %c0_11] : memref<1x256xf32, #tpu.memory_space<vmem>>, vector<1x256xf32>
    tpu.vector_store %arg6[%c0_10, %c0_11], %15 {strides = array<i32>} : memref<1x256xf32, #tpu.memory_space<vmem>>, vector<1x256xf32>,
    return
  }
  func.func @transform_0(%arg0: i32) -> (i32, i32) {
    %c0_i32 = arith.constant 0 : i32
    %c0_i32_0 = arith.constant 0 : i32
    return %arg0, %c0_i32 : i32, i32
  }
  func.func @transform_1(%arg0: i32) -> (i32, i32) {
    %c0_i32 = arith.constant 0 : i32
    %c0_i32_0 = arith.constant 0 : i32
    %c0_i32_1 = arith.constant 0 : i32
    return %c0_i32, %c0_i32_0 : i32, i32
  }
  func.func @transform_2(%arg0: i32) -> (i32, i32) {
    %c0_i32 = arith.constant 0 : i32
    %c0_i32_0 = arith.constant 0 : i32
    %c0_i32_1 = arith.constant 0 : i32
    return %c0_i32, %c0_i32_0 : i32, i32
  }
  func.func @transform_3(%arg0: i32) -> (i32, i32) {
    %c0_i32 = arith.constant 0 : i32
    %c0_i32_0 = arith.constant 0 : i32
    %c0_i32_1 = arith.constant 0 : i32
    return %c0_i32, %c0_i32_0 : i32, i32
  }
  func.func @transform_4(%arg0: i32) -> i32 {
    %c0_i32 = arith.constant 0 : i32
    %c0_i32_0 = arith.constant 0 : i32
    return %c0_i32 : i32
  }
  func.func @transform_5(%arg0: i32) -> (i32, i32) {
    %c0_i32 = arith.constant 0 : i32
    %c0_i32_0 = arith.constant 0 : i32
    return %c0_i32, %arg0 : i32, i32
  }
}

</mosaic_0001>

<bundles_post_ra>
// kernel: tpu_custom_call.1
= control target key start
LH: loop header
LB: loop body
LE: loop exit
PB: predicated region body
PF: predicated region fallthrough
CT: control target
= control target key end

     0   :  { %s1074_s0 = inlined_call_operand.vmem [shape: bf16[1024,16], index: 0, kind: input, shape index: {}]   ;;  %s1075_s1 = inlined_call_operand.vmem [shape: bf16[32,16], index: 1, kind: input, shape index: {}]   ;;  %s1076_s2 = inlined_call_operand.vmem [shape: f32[32,1], index: 2, kind: input, shape index: {}]   ;;  %s1077_s3 = inlined_call_operand.vmem [shape: f32[32,1], index: 3, kind: input, shape index: {}]   ;;  %s1078_s4 = inlined_call_operand.<no memory space> [shape: f32[1], index: 4, kind: input, shape index: {}]   ;;  %s1079_s5 = inlined_call_operand.hbm [shape: f32[1,1024], index: 5, kind: output, shape index: {}]  }
   0x1   :  { %10 = sst [smem:[#allocation2]] %s1078_s4 }
   0x2   :  { %11 = vsyncpa [#allocation4], 0 }
   0x3   :  { %13 = vsyncpa [#allocation4 + $0x1], 0  ;;  %s891_s20 = smov 0   ;;  %s893_s21 = smov 0  }
   0x4   :  { %s895_s22 = smov 0   ;;  %s897_s23 = smov 0  }
   0x5 LB: > { %s644_s4 = sadd.s32 4294967295, %s853_s23   ;;  %s645_s24 = sadd.s32 4294967294, %s853_s23   ;;  %s853_s23 = sphi %s897_s23, %s1085_s23   ;;  %s849_s22 = sphi %s895_s22, %s1084_s22   ;;  %s845_s21 = sphi %s893_s21, %s1083_s21   ;;  %s841_s20 = sphi %s891_s20, %s1082_s20  }
   0x6   : > { %s914_s25 = sadd.s32 1, %s853_s23   ;;  %s136_s26 = sadd.s32 1, %s849_s22 }
   0x7   : > { %s133_s27 = ssub.s32 %s853_s23, %s914_s25  ;;  %p146_p0 = scmp.ne.s32.totalorder %s849_s22, %s845_s21 }
   0x8   : > { %p134_p1 = scmp.eq.s32.totalorder %s133_s27, 0  ;;  %p147_p2 = scmp.eq.s32.totalorder %s644_s4, 3 }
   0x9   : > { %p152_p3 = scmp.ne.s32.totalorder %s845_s21, %s841_s20  ;;  %p153_p4 = scmp.eq.s32.totalorder %s645_s24, 3 }
   0xa   : > { %s924_s28 = scalar_select %p134_p1, %s849_s22, %s136_s26  }
   0xb   : > { %p926_p5 = por %p147_p2, %p146_p0  ;;  %p930_p6 = por %p153_p4, %p152_p3 }
   0xc   : > { %p648_p7 = scmp.ge.s32.totalorder %s853_s23, 1  ;;  %p192_p8 = scmp.lt.s32.totalorder %s853_s23, 5 }
   0xe   : > { %p193_p9 = pnand %p648_p7, %p192_p8 }
   0xf   : > { %s936_s6 = sshll.u32 (!%p193_p9), %s644_s4, 5  ;;  %v942_v0 = vld [vmem:[%s1075_s1] sm:$0xff] (!%p193_p9)   ;;  %vm378_vm0 = vcmask (!%p193_p9), 130048   ;;  %v947_v1 = vld [vmem:[%s1075_s1 + $0x8] sm:$0xff] (!%p193_p9)   ;;  %v855_v3 = vmov (!%p193_p9), 0   ;;  %v266_v4 = vld [vmem:[%s1076_s2 + $0x10] sm:$0xff] (!%p193_p9) }
  0x10   : > { %196 = sbr.rel (%p193_p9) target bundleno = 354 (0x162), region = 40  ;;  %p221_p10 = scmp.lt.s32.totalorder (!%p193_p9), %s936_s6, 127  ;;  %v264_v2 = vld [vmem:[%s1076_s2] sm:$0xff] (!%p193_p9)  ;;  %694 = vmatprep.mubr.msk.bf16.mxu0 (!%p193_p9), %vm378_vm0, %v942_v0  ;;  %771 = vset.pattern.permute.xlu0 (!%p193_p9), %v855_v3  ;;  %v265_v5 = vld [vmem:[%s1076_s2 + $0x8] sm:$0xff] (!%p193_p9)  ;;  %v267_v6 = vld [vmem:[%s1076_s2 + $0x18] sm:$0xff] (!%p193_p9) }
  0x11   : > { %696 = vmatprep.mubr.msk.bf16.mxu1 (!%p193_p9), %vm378_vm0, %v947_v1  ;;  %270 = vperm.xlu0 (!%p193_p9), %771, %v264_v2   ;;  %v494_v11 = vld [vmem:[%s1077_s3] sm:$0xff] (!%p193_p9)  ;;  %v495_v12 = vld [vmem:[%s1077_s3 + $0x8] sm:$0xff] (!%p193_p9)  ;;  %v496_v14 = vld [vmem:[%s1077_s3 + $0x10] sm:$0xff] (!%p193_p9)  ;;  %s544_s15 = sld [smem:[#allocation2]] (!%p193_p9)  ;;  %s1032_s26 = scalar_lea.hbm (!%p193_p9), %s1079_s5, %s936_s6 }
  0x12   : > { %772 = vset.pattern.permute.xlu1 (!%p193_p9), %v855_v3  ;;  %v497_v15 = vld [vmem:[%s1077_s3 + $0x18] sm:$0xff] (!%p193_p9)  ;;  %s857_s8 = smov (!%p193_p9), [#allocation3]  }
  0x13   : > { %280 = vperm.xlu1 (!%p193_p9), %772, %v266_v4   ;;  %s795_s9 = sshll.u32 (!%p193_p9), %s857_s8, 4  ;;  %s796_s9 = int_to_ptr.vmem [resolvable:$false] %s795_s9 }
  0x14   : > { %s797_s10 = scalar_lea.vmem (!%p193_p9), %s796_s9, 64 }
  0x15   : > { %275 = vperm.xlu0 (!%p193_p9), %771, %v265_v5  }
  0x17   : > { %s222_s13 = scalar_select %p221_p10, %s936_s6, 127  ;;  %285 = vperm.xlu1 %772, %v267_v6  }
  0x19   : > { %s651_s16 = sshll.u32 %s222_s13, 2  ;;  %500 = vperm.xlu0 %771, %v494_v11  }
  0x1a   : > { %s966_s24 = scalar_lea.vmem %s1074_s0, %s651_s16  ;;  %s217_s16 = sand.u32 1, %s845_s21  }
  0x1b   : > { %v773_v7 = vld [vmem:[%s966_s24 + $0x40] sm:$0xff]   ;;  %v775_v9 = vld [vmem:[%s966_s24 + $0x48] sm:$0xff]   ;;  %505 = vperm.xlu1 %772, %v495_v12   ;;  %v777_v17 = vld [vmem:[%s966_s24 + $0x50] sm:$0xff]   ;;  %s649_s17 = sshll.u32 %s217_s16, 1  ;;  %s572_s27 = scalar_lea.sflag [#allocation4], %s217_s16 }
  0x1c   : > { %v774_v8 = vld [vmem:[%s966_s24] sm:$0xff]   ;;  %714 = vmatprep.subr.msk.bf16.mxu0 %vm378_vm0, %v773_v7  ;;  %715 = vmatprep.subr.msk.bf16.mxu1 %vm378_vm0, %v773_v7  ;;  %v776_v13 = vld [vmem:[%s966_s24 + $0x8] sm:$0xff]   ;;  %v778_v18 = vld [vmem:[%s966_s24 + $0x10] sm:$0xff]   ;;  %s219_s18 = scalar_lea.vmem [#allocation3], %s649_s17 }
  0x1d   : > { %v386_v10 = vsel %vm378_vm0, %v774_v8, 0  ;;  %v389_v16 = vsel %vm378_vm0, %v776_v13, 0  ;;  %510 = vperm.xlu0 %771, %v496_v14   ;;  %v392_v19 = vsel %vm378_vm0, %v778_v18, 0  ;;  %v779_v20 = vld [vmem:[%s966_s24 + $0x58] sm:$0xff]   ;;  %v781_v23 = vld [vmem:[%s966_s24 + $0x60] sm:$0xff]   ;;  %v783_v26 = vld [vmem:[%s966_s24 + $0x68] sm:$0xff]  }
  0x1e   : > { %679 = vmatpush3.bf16.xpose.msra.mxu0 %v386_v10  ;;  %706 = vmatpush3.bf16.xpose.msra.mxu1 %v386_v10  ;;  %v780_v21 = vld [vmem:[%s966_s24 + $0x18] sm:$0xff]   ;;  %v782_v24 = vld [vmem:[%s966_s24 + $0x20] sm:$0xff]   ;;  %v784_v27 = vld [vmem:[%s966_s24 + $0x28] sm:$0xff]   ;;  %s586_s19 = sshll.u32 %s219_s18, 4  ;;  %s1034_s19 = int_to_ptr.vmem [resolvable:$true] %s586_s19 }
  0x1f   : > { %716 = vmatprep.subr.msk.bf16.mxu0 %vm378_vm0, %v775_v9  ;;  %717 = vmatprep.subr.msk.bf16.mxu1 %vm378_vm0, %v775_v9  ;;  %v395_v22 = vsel %vm378_vm0, %v780_v21, 0  ;;  %v398_v25 = vsel %vm378_vm0, %v782_v24, 0  ;;  %v401_v28 = vsel %vm378_vm0, %v784_v27, 0  ;;  %v785_v29 = vld [vmem:[%s966_s24 + $0x70] sm:$0xff]   ;;  %v787_v32 = vld [vmem:[%s966_s24 + $0x78] sm:$0xff]   ;;  %s791_s7 = scalar_lea.vmem %s1034_s19, 32  ;;  %p798_p0 = scmp.lt.s32.totalorder %s1034_s19, %s796_s9 }
  0x20   : > { %515 = vperm.xlu1 %772, %v497_v15   ;;  %v786_v30 = vld [vmem:[%s966_s24 + $0x30] sm:$0xff]   ;;  %v788_v33 = vld [vmem:[%s966_s24 + $0x38] sm:$0xff]   ;;  %p792_p11 = scmp.ne.s32.totalorder %s1034_s19, %s791_s7  ;;  %p799_p1 = scmp.lt.s32.totalorder %s797_s10, %s791_s7 }
  0x21   : > { %v404_v31 = vsel %vm378_vm0, %v786_v30, 0  ;;  %v407_v34 = vsel %vm378_vm0, %v788_v33, 0 }
  0x22   : > { %p793_p12 = pnand %p792_p11, %p926_p5  ;;  %p800_p2 = por %p799_p1, %p798_p0 }
  0x24   : > { %p794_p13 = pneg %p793_p12 }
  0x26   : > { %681 = vmatpush3.bf16.xpose.msra.mxu0 %v389_v16  ;;  %707 = vmatpush3.bf16.xpose.msra.mxu1 %v389_v16  ;;  %p801_p3 = pnand %p800_p2, %p794_p13 }
  0x27   : > { %718 = vmatprep.subr.msk.bf16.mxu0 %vm378_vm0, %v777_v17  ;;  %719 = vmatprep.subr.msk.bf16.mxu1 %vm378_vm0, %v777_v17 }
  0x2e   : > { %683 = vmatpush3.bf16.xpose.msra.mxu0 %v392_v19  ;;  %708 = vmatpush3.bf16.xpose.msra.mxu1 %v392_v19 }
  0x2f   : > { %720 = vmatprep.subr.msk.bf16.mxu0 %vm378_vm0, %v779_v20  ;;  %721 = vmatprep.subr.msk.bf16.mxu1 %vm378_vm0, %v779_v20 }
  0x36   : > { %685 = vmatpush3.bf16.xpose.msra.mxu0 %v395_v22  ;;  %709 = vmatpush3.bf16.xpose.msra.mxu1 %v395_v22 }
  0x37   : > { %722 = vmatprep.subr.msk.bf16.mxu0 %vm378_vm0, %v781_v23  ;;  %723 = vmatprep.subr.msk.bf16.mxu1 %vm378_vm0, %v781_v23  ;;  %v856_v23 = vmov 1966171168  }
  0x38   : > { %v552_v24 = vunpack.c.l.s4 %v856_v23 }
  0x3e   : > { %687 = vmatpush3.bf16.xpose.msra.mxu0 %v398_v25  ;;  %710 = vmatpush3.bf16.xpose.msra.mxu1 %v398_v25  ;;  %v554_v25 = vlaneseq }
  0x3f   : > { %724 = vmatprep.subr.msk.bf16.mxu0 %vm378_vm0, %v783_v26  ;;  %725 = vmatprep.subr.msk.bf16.mxu1 %vm378_vm0, %v783_v26 }
  0x40   : > { %vm568_vm1 = vcmp.lt.s32.totalorder %v554_v25, 256 }
  0x46   : > { %689 = vmatpush3.bf16.xpose.msra.mxu0 %v401_v28  ;;  %711 = vmatpush3.bf16.xpose.msra.mxu1 %v401_v28 }
  0x47   : > { %726 = vmatprep.subr.msk.bf16.mxu0 %vm378_vm0, %v785_v29  ;;  %727 = vmatprep.subr.msk.bf16.mxu1 %vm378_vm0, %v785_v29  ;;  %v545_v29 = vstv %s544_s15 }
  0x4e   : > { %691 = vmatpush3.bf16.xpose.msra.mxu0 %v404_v31  ;;  %712 = vmatpush3.bf16.xpose.msra.mxu1 %v404_v31  ;;  %v553_v31 = vunpack.c.0.s8 %v552_v24 }
  0x4f   : > { %728 = vmatprep.subr.msk.bf16.mxu0 %vm378_vm0, %v787_v32  ;;  %729 = vmatprep.subr.msk.bf16.mxu1 %vm378_vm0, %v787_v32  ;;  %v555_v32 = vshrl.u32 %v554_v25, 7 }
  0x56   : > { %693 = vmatpush3.bf16.xpose.msra.mxu0 %v407_v34  ;;  %713 = vmatpush3.bf16.xpose.msra.mxu1 %v407_v34 }
  0x5d   : > { %695 = vmatmul.mubr.msk.bf16.vlgmr.msra.gmra.mrb[0].mxu0 %vm378_vm0, %v942_v0  ;;  %697 = vmatmul.mubr.msk.bf16.vlgmr.msra.gmra.mrb[0].mxu1 %vm378_vm0, %v947_v1 }
  0x90   : > { %v271_v35 = vpop.permute.xlu0 %270 }
  0x92   : > { %v281_v36 = vpop.permute.xlu1 %280 }
  0x94   : > { %v276_v37 = vpop.permute.xlu0 %275 }
  0x96   : > { %v286_v38 = vpop.permute.xlu1 %285 }
  0x98   : > { %v501_v39 = vpop.permute.xlu0 %500 }
  0x9a   : > { %v506_v55 = vpop.permute.xlu1 %505 }
  0x9c   : > { %v511_v2 = vpop.permute.xlu0 %510 }
  0x9f   : > { %v516_v8 = vpop.permute.xlu1 %515 }
 0x130   : > { %v467_v40 = vpop.f32.mrb[0].mxu0  ;;  %v477_v41 = vpop.f32.mrb[0].mxu1 }
 0x131   : > { %v468_v42 = vadd.f32 %v467_v40, %v271_v35  ;;  %v478_v43 = vadd.f32 %v477_v41, %v281_v36  ;;  %v469_v44 = vpop.f32.mrb[1].mxu0  ;;  %v479_v45 = vpop.f32.mrb[1].mxu1 }
 0x132   : > { %v470_v46 = vadd.f32 %v469_v44, %v271_v35  ;;  %v480_v47 = vadd.f32 %v479_v45, %v281_v36  ;;  %v471_v48 = vpop.f32.mrb[2].mxu0  ;;  %v481_v49 = vpop.f32.mrb[2].mxu1 }
 0x133   : > { %v486_v50 = vmax.f32 %v468_v42, 0.0  ;;  %v472_v51 = vadd.f32 %v471_v48, %v276_v37  ;;  %v482_v52 = vadd.f32 %v481_v49, %v286_v38  ;;  %v473_v53 = vpop.f32.mrb[3].mxu0  ;;  %v483_v54 = vpop.f32.mrb[3].mxu1  ;;  %v490_v59 = vmax.f32 %v478_v43, 0.0 }
 0x134   : > { %v487_v56 = vmax.f32 %v470_v46, 0.0  ;;  %v474_v57 = vadd.f32 %v473_v53, %v276_v37  ;;  %v484_v58 = vadd.f32 %v483_v54, %v286_v38  ;;  %v491_v61 = vmax.f32 %v480_v47, 0.0 }
 0x135   : > { %v488_v60 = vmax.f32 %v472_v51, 0.0  ;;  %v518_v63 = vmul.f32 %v501_v39, %v486_v50  ;;  %v492_v1 = vmax.f32 %v482_v52, 0.0  ;;  %v522_v6 = vmul.f32 %v511_v2, %v490_v59 }
 0x136   : > { %v489_v62 = vmax.f32 %v474_v57, 0.0  ;;  %v519_v3 = vmul.f32 %v501_v39, %v487_v56  ;;  %v493_v5 = vmax.f32 %v484_v58, 0.0  ;;  %v523_v9 = vmul.f32 %v511_v2, %v491_v61 }
 0x137   : > { %v520_v0 = vmul.f32 %v506_v55, %v488_v60  ;;  %v524_v11 = vmul.f32 %v516_v8, %v492_v1  ;;  %v556_v37 = vsub.s32 %v553_v31, %v555_v32 }
 0x138   : > { %v521_v4 = vmul.f32 %v506_v55, %v489_v62  ;;  %v525_v13 = vmul.f32 %v516_v8, %v493_v5 }
 0x139   : > { %v526_v7 = vadd.f32 %v520_v0, %v518_v63 }
 0x13a   : > { %v535_v10 = vadd.f32 %v521_v4, %v519_v3 }
 0x13b   : > { %v527_v12 = vadd.f32 %v526_v7, %v522_v6 }
 0x13c   : > { %v536_v14 = vadd.f32 %v535_v10, %v523_v9 }
 0x13d   : > { %v528_v15 = vadd.f32 %v527_v12, %v524_v11 }
 0x13e   : > { %v537_v16 = vadd.f32 %v536_v14, %v525_v13 }
 0x13f   : > { %v529_v17 = vrot.slane %v528_v15, 4 }
 0x140   : > { %v538_v18 = vrot.slane %v537_v16, 4 }
 0x141   : > { %v530_v19 = vadd.f32 %v529_v17, %v528_v15 }
 0x142   : > { %v539_v20 = vadd.f32 %v538_v18, %v537_v16 }
 0x143   : > { %v531_v21 = vrot.slane %v530_v19, 2 }
 0x144   : > { %v540_v22 = vrot.slane %v539_v20, 2 }
 0x145   : > { %v532_v26 = vadd.f32 %v531_v21, %v530_v19 }
 0x146   : > { %v541_v27 = vadd.f32 %v540_v22, %v539_v20 }
 0x147   : > { %v533_v28 = vrot.slane %v532_v26, 1 }
 0x148   : > { %v542_v30 = vrot.slane %v541_v27, 1 }
 0x149   : > { %v534_v33 = vadd.f32 %v533_v28, %v532_v26 }
 0x14a   : > { %v543_v34 = vadd.f32 %v542_v30, %v541_v27 }
 0x14b   : > { %v546_v35 = vadd.f32 %v545_v29, %v534_v33 }
 0x14c   : > { %v547_v36 = vadd.f32 %v545_v29, %v543_v34 }
 0x14e   : > { %v550_v38 = vcombine.low %v546_v35, %v547_v36 }
 0x150   : > { %v557_v39 = vrot.slane %v550_v38, %v556_v37 }
 0x152   : > { %v564_v40 = vrot.slane %v557_v39, %v556_v37 }
 0x154   : > { %570 = vst.msk [vmem:[%s219_s18] sm:$0x3] %vm568_vm1, %v564_v40 }
 0x155   : > { %804 = shalt.err (!%p801_p3)
}
 0x156   : > { %s805_s6 = scalar_lea.hbm %s1032_s26, 32  ;;  %s809_s13 = scalar_lea.hbm %s1079_s5, 128 }
 0x157   : > { %p806_p4 = scmp.ne.s32.totalorder %s1032_s26, %s805_s6  ;;  %p810_p9 = scmp.lt.u32.totalorder %s1032_s26, %s1079_s5 }
 0x158   : > { %p811_p10 = scmp.lt.u32.totalorder %s809_s13, %s805_s6  ;;  %p813_p12 = scmp.lt.u32.totalorder %s805_s6, %s1032_s26 }
 0x159   : > { %p807_p7 = pnand %p806_p4, %p926_p5 }
 0x15a   : > { %p812_p11 = por %p811_p10, %p810_p9 }
 0x15b   : > { %p808_p8 = pneg %p807_p7 }
 0x15c   : > { %p814_p13 = por %p813_p12, %p812_p11 }
 0x15e   : > { %p815_p0 = pnand %p814_p13, %p808_p8 }
 0x160   : > { %818 = shalt.err (!%p815_p0)
}
 0x161   : > { %730 = dma.vmem_to_hbm [thread:$0]  (%p926_p5), %s1034_s19, 32, %s1032_s26, %s572_s27  }
 0x162 PF: > { %p736_p1 = scmp.ge.s32.totalorder %s853_s23, 2  ;;  %s598_s16 = sand.u32 1, %s841_s20  }
 0x163   : > { %s599_s17 = scalar_lea.sflag [#allocation4], %s598_s16 }
 0x164   : > { %p733_p2 = pnand %p736_p1, %p930_p6 }
 0x166   : > { %836 = dma.done.wait (!%p733_p2), %s599_s17, 32  }
 0x167   : > { %838 = vsyncadd (!%p733_p2), %s599_s17, 4294967264  ;;  %p16_p3 = scmp.ge.s32.totalorder %s914_s25, 6   ;;  %s1082_s20 = smov %s845_s21 }
 0x168   : > { %s1083_s21 = smov %s849_s22  ;;  %s1084_s22 = smov %s924_s28 }
 0x169   : > { %s1085_s23 = smov %s914_s25  ;;  %18 = sbr.rel (!%p16_p3) target bundleno = 5 (0x5), region = 75 }
 0x170   :  { %604 = vsyncpa [#allocation4], 1 }
 0x171   :  { %606 = vsyncpa [#allocation4 + $0x1], 1 }

</bundles_post_ra>
